<compile_context>
chip_gen: v5e
topology: v5e:2x2
jax: 0.10.0
libtpu: 0.0.40
codegen_flags: <defaults>
</compile_context>

<pallas_src>
import functools
import math

import jax
import jax.numpy as jnp
from jax import lax
from jax.experimental import pallas as pl
from jax.experimental.pallas import tpu as pltpu

_INV_SQRT2 = 1.0 / math.sqrt(2.0)


def _transform_kernel(x_ref, w_ref, b_ref, gamma_ref, beta_ref, o_ref, *,
                      eps, inv_hidden, mxu_dtype):
    x = x_ref[...]                      # (TM, H)
    w = w_ref[...]                      # (H_in, H_out) — pre-transposed in wrapper
    if mxu_dtype is not None:
        x = x.astype(mxu_dtype)         # weight already cast in the wrapper

    # Dense: x @ W_t + b.  Standard (1,0) contraction -> RHS contracted on its
    # major (sublane) dim, so no per-tile transpose of W; f32 accumulation.
    h = jnp.dot(x, w, preferred_element_type=jnp.float32)
    h = h + b_ref[...].astype(jnp.float32)

    # GELU — exact erf form, matching torch.nn.GELU() default.
    # TODO(synk): jax.nn.gelu(h, approximate=True) would move this onto the EUP
    # (free slot under the matmul on v6e/v7x) at ~1e-3 numeric drift.
    h = 0.5 * h * (1.0 + lax.erf(h * _INV_SQRT2))

    # LayerNorm over last dim, fused single-pass statistics.
    s1 = jnp.sum(h, axis=-1, keepdims=True)
    s2 = jnp.sum(h * h, axis=-1, keepdims=True)
    mean = s1 * inv_hidden
    var = jnp.maximum(s2 * inv_hidden - mean * mean, 0.0)   # guard f32 cancellation
    inv = lax.rsqrt(var + eps)
    out = (h - mean) * inv * gamma_ref[...].astype(jnp.float32) \
        + beta_ref[...].astype(jnp.float32)

    o_ref[...] = out.astype(o_ref.dtype)


def _vmem_capacity_bytes():
    try:
        info = pltpu.get_tpu_info()
        cap = int(getattr(info, "vmem_capacity_bytes", 0))
        return cap if cap > 0 else None
    except Exception:
        return None


def _make_specs(TM, H, stream_depth, with_buffering):
    def spec(shape, imap, depth):
        if with_buffering:
            return pl.BlockSpec(shape, imap, pipeline_mode=pl.Buffered(depth))
        return pl.BlockSpec(shape, imap)

    in_specs = [
        spec((TM, H), lambda i: (i, 0), stream_depth),   # x: streamed row tiles
        spec((H, H), lambda i: (0, 0), 1),               # W: resident, single buffer
        spec((1, H), lambda i: (0, 0), 1),               # bias:  resident
        spec((1, H), lambda i: (0, 0), 1),               # gamma: resident
        spec((1, H), lambda i: (0, 0), 1),               # beta:  resident
    ]
    out_spec = spec((TM, H), lambda i: (i, 0), stream_depth)
    return in_specs, out_spec


def bert_prediction_head_transform(x, weight, bias, gamma, beta, eps, *, mxu_dtype=None):
    """x: (batch, seq, hidden); weight: (hidden, hidden) torch-style (out, in).

    mxu_dtype: optionally cast matmul operands (e.g. jnp.bfloat16) for native
    MXU rate; default None keeps exact f32 semantics of the PyTorch module.
    """
    B, S, H = x.shape
    M = B * S

    vmem_cap = _vmem_capacity_bytes()
    big_vmem = vmem_cap is not None and vmem_cap >= (100 << 20)   # v5e / v6e (128 MiB)
    tm_cap = 1024 if big_vmem else 512                            # keep TM <= 512 on v7x
    TM = min(tm_cap, max(8, -(-M // 8) * 8))                      # sublane-aligned
    grid = (pl.cdiv(M, TM),)                                      # ragged last tile OK (row-wise op)
    stream_depth = 3 if big_vmem else 2

    x2 = x.reshape(M, H)
    w_t = weight.T                                                # one-time (in, out) layout
    if mxu_dtype is not None:
        w_t = w_t.astype(mxu_dtype)
    b2 = bias.reshape(1, H)
    g2 = gamma.reshape(1, H)
    be2 = beta.reshape(1, H)

    x_item = jnp.dtype(x.dtype).itemsize
    w_item = jnp.dtype(w_t.dtype).itemsize
    v_item = jnp.dtype(bias.dtype).itemsize

    # VMEM demand: streamed x/out (stream_depth buffers each), resident W and
    # vectors (single buffer), plus headroom for f32 intermediates and Mosaic
    # internal scratch.  Cap at 40 MiB so v7x (64 MiB/TC) keeps slack.
    vmem_need = (2 * stream_depth * TM * H * x_item
                 + H * H * w_item
                 + 3 * H * v_item)
    vmem_limit = int(min(max(2 * vmem_need + (4 << 20), 16 << 20), 40 << 20))

    cost = pl.CostEstimate(
        flops=2 * M * H * H,
        transcendentals=M * H,
        bytes_accessed=2 * M * H * x_item + H * H * w_item + 3 * H * v_item,
    )

    kernel = functools.partial(_transform_kernel, eps=float(eps),
                               inv_hidden=1.0 / float(H), mxu_dtype=mxu_dtype)

    last_err = None
    out = None
    for with_buffering in (True, False):   # fallback if pipeline_mode unsupported
        in_specs, out_spec = _make_specs(TM, H, stream_depth, with_buffering)
        call = pl.pallas_call(
            kernel,
            out_shape=jax.ShapeDtypeStruct((M, H), x.dtype),
            grid=grid,
            in_specs=in_specs,
            out_specs=out_spec,
            compiler_params=pltpu.CompilerParams(
                dimension_semantics=("parallel",),    # megacore-shardable on v7x
                vmem_limit_bytes=vmem_limit,
            ),
            cost_estimate=cost,
        )
        try:
            out = call(x2, w_t, b2, g2, be2)
            break
        except Exception as e:
            last_err = e
    if out is None:
        raise last_err
    return out.reshape(B, S, H)


if __name__ == "__main__":
    batch, seq, hidden = 2, 8, 128     # lane-dense H, still small
    layer_norm_eps = 1e-12

    key = jax.random.PRNGKey(0)
    kx, kw, kb, kg, kbe = jax.random.split(key, 5)

    x = jax.random.normal(kx, (batch, seq, hidden), dtype=jnp.float32)
    # Deterministic synthetic parameters (torch-style (out, in) weight layout).
    weight = jax.random.normal(kw, (hidden, hidden), dtype=jnp.float32) * (1.0 / math.sqrt(hidden))
    bias = jax.random.normal(kb, (hidden,), dtype=jnp.float32) * 0.02
    gamma = 1.0 + 0.1 * jax.random.normal(kg, (hidden,), dtype=jnp.float32)
    beta = 0.1 * jax.random.normal(kbe, (hidden,), dtype=jnp.float32)

    out = bert_prediction_head_transform(x, weight, bias, gamma, beta, layer_norm_eps)
    jax.block_until_ready(out)

    # Reference check in plain JAX (same math as the PyTorch module).
    h = x @ weight.T + bias
    h = 0.5 * h * (1.0 + jax.lax.erf(h / math.sqrt(2.0)))
    mean = jnp.mean(h, axis=-1, keepdims=True)
    var = jnp.mean((h - mean) ** 2, axis=-1, keepdims=True)
    ref = (h - mean) / jnp.sqrt(var + layer_norm_eps) * gamma + beta
    assert jnp.allclose(out, ref, atol=1e-4, rtol=1e-4), "mismatch vs reference"

    print("KERNEL_OK")
</pallas_src>

<mosaic_0001>
module attributes {stable_mosaic.version = 11 : i64} {
  func.func @_transform_kernel(%arg0: i32, %arg1: memref<16x128xf32, #tpu.memory_space<vmem>>, %arg2: memref<128x128xf32, #tpu.memory_space<vmem>>, %arg3: memref<1x128xf32, #tpu.memory_space<vmem>>, %arg4: memref<1x128xf32, #tpu.memory_space<vmem>>, %arg5: memref<1x128xf32, #tpu.memory_space<vmem>>, %arg6: memref<16x128xf32, #tpu.memory_space<vmem>>) attributes {dimension_semantics = [#tpu.dimension_semantics<parallel>], iteration_bounds = array<i64: 1>, scalar_prefetch = 0 : i64, scratch_operands = 0 : i64, tpu.core_type = #tpu.core_type<tc>, window_params = [{pipeline_mode = #tpu.pipeline_mode<double_buffered>, transform_indices = @transform_0, window_bounds = array<i64: 16, 128>}, {pipeline_mode = #tpu.pipeline_mode<synchronous>, transform_indices = @transform_1, window_bounds = array<i64: 128, 128>}, {pipeline_mode = #tpu.pipeline_mode<synchronous>, transform_indices = @transform_2, window_bounds = array<i64: 1, 128>}, {pipeline_mode = #tpu.pipeline_mode<synchronous>, transform_indices = @transform_3, window_bounds = array<i64: 1, 128>}, {pipeline_mode = #tpu.pipeline_mode<synchronous>, transform_indices = @transform_4, window_bounds = array<i64: 1, 128>}, {pipeline_mode = #tpu.pipeline_mode<double_buffered>, transform_indices = @transform_5, window_bounds = array<i64: 16, 128>}]} {
    %c0 = arith.constant 0 : index
    %c0_0 = arith.constant 0 : index
    %0 = vector.load %arg1[%c0, %c0_0] : memref<16x128xf32, #tpu.memory_space<vmem>>, vector<16x128xf32>
    %c0_1 = arith.constant 0 : index
    %c0_2 = arith.constant 0 : index
    %1 = vector.load %arg2[%c0_1, %c0_2] : memref<128x128xf32, #tpu.memory_space<vmem>>, vector<128x128xf32>
    %cst = arith.constant dense<0.000000e+00> : vector<16x128xf32>
    %2 = tpu.matmul %0, %1, %cst {dimension_numbers = #tpu.dot_dimension_numbers<[1], [0], [0], [1], [0, 0, 1, 1], [], []>} : vector<16x128xf32>, vector<128x128xf32>, vector<16x128xf32> -> vector<16x128xf32>
    %c0_3 = arith.constant 0 : index
    %c0_4 = arith.constant 0 : index
    %3 = vector.load %arg3[%c0_3, %c0_4] : memref<1x128xf32, #tpu.memory_space<vmem>>, vector<1x128xf32>
    %4 = vector.broadcast %3 : vector<1x128xf32> to vector<16x128xf32>
    %5 = arith.addf %2, %4 : vector<16x128xf32>
    %cst_5 = arith.constant 5.000000e-01 : f32
    %6 = vector.broadcast %cst_5 : f32 to vector<16x128xf32>
    %7 = arith.mulf %6, %5 : vector<16x128xf32>
    %cst_6 = arith.constant 0.707106769 : f32
    %8 = vector.broadcast %cst_6 : f32 to vector<16x128xf32>
    %9 = arith.mulf %5, %8 : vector<16x128xf32>
    %10 = math.erf %9 : vector<16x128xf32>
    %cst_7 = arith.constant 1.000000e+00 : f32
    %11 = vector.broadcast %cst_7 : f32 to vector<16x128xf32>
    %12 = arith.addf %11, %10 : vector<16x128xf32>
    %13 = arith.mulf %7, %12 : vector<16x128xf32>
    %cst_8 = arith.constant dense<0.000000e+00> : vector<16xf32>
    %14 = vector.multi_reduction <add>, %13, %cst_8 [1] : vector<16x128xf32> to vector<16xf32>
    %15 = vector.shape_cast %14 : vector<16xf32> to vector<16x1xf32>
    %16 = arith.mulf %13, %13 : vector<16x128xf32>
    %cst_9 = arith.constant dense<0.000000e+00> : vector<16xf32>
    %17 = vector.multi_reduction <add>, %16, %cst_9 [1] : vector<16x128xf32> to vector<16xf32>
    %18 = vector.shape_cast %17 : vector<16xf32> to vector<16x1xf32>
    %cst_10 = arith.constant 7.812500e-03 : f32
    %19 = vector.broadcast %cst_10 : f32 to vector<16x1xf32>
    %20 = arith.mulf %15, %19 : vector<16x1xf32>
    %cst_11 = arith.constant 7.812500e-03 : f32
    %21 = vector.broadcast %cst_11 : f32 to vector<16x1xf32>
    %22 = arith.mulf %18, %21 : vector<16x1xf32>
    %23 = arith.mulf %20, %20 : vector<16x1xf32>
    %24 = arith.subf %22, %23 : vector<16x1xf32>
    %cst_12 = arith.constant 0.000000e+00 : f32
    %25 = vector.broadcast %cst_12 : f32 to vector<16x1xf32>
    %26 = arith.maximumf %24, %25 : vector<16x1xf32>
    %cst_13 = arith.constant 9.99999996E-13 : f32
    %27 = vector.broadcast %cst_13 : f32 to vector<16x1xf32>
    %28 = arith.addf %26, %27 : vector<16x1xf32>
    %29 = math.rsqrt %28 : vector<16x1xf32>
    %30 = vector.broadcast %20 : vector<16x1xf32> to vector<16x128xf32>
    %31 = arith.subf %13, %30 : vector<16x128xf32>
    %32 = vector.broadcast %29 : vector<16x1xf32> to vector<16x128xf32>
    %33 = arith.mulf %31, %32 : vector<16x128xf32>
    %c0_14 = arith.constant 0 : index
    %c0_15 = arith.constant 0 : index
    %34 = vector.load %arg4[%c0_14, %c0_15] : memref<1x128xf32, #tpu.memory_space<vmem>>, vector<1x128xf32>
    %35 = vector.broadcast %34 : vector<1x128xf32> to vector<16x128xf32>
    %36 = arith.mulf %33, %35 : vector<16x128xf32>
    %c0_16 = arith.constant 0 : index
    %c0_17 = arith.constant 0 : index
    %37 = vector.load %arg5[%c0_16, %c0_17] : memref<1x128xf32, #tpu.memory_space<vmem>>, vector<1x128xf32>
    %38 = vector.broadcast %37 : vector<1x128xf32> to vector<16x128xf32>
    %39 = arith.addf %36, %38 : vector<16x128xf32>
    %c0_18 = arith.constant 0 : index
    %c0_19 = arith.constant 0 : index
    %40 = vector.load %arg6[%c0_18, %c0_19] : memref<16x128xf32, #tpu.memory_space<vmem>>, vector<16x128xf32>
    tpu.vector_store %arg6[%c0_18, %c0_19], %39 {strides = array<i32>} : memref<16x128xf32, #tpu.memory_space<vmem>>, vector<16x128xf32>,
    return
  }
  func.func @transform_0(%arg0: i32) -> (i32, i32) {
    %c0_i32 = arith.constant 0 : i32
    %c0_i32_0 = arith.constant 0 : i32
    return %arg0, %c0_i32 : i32, i32
  }
  func.func @transform_1(%arg0: i32) -> (i32, i32) {
    %c0_i32 = arith.constant 0 : i32
    %c0_i32_0 = arith.constant 0 : i32
    %c0_i32_1 = arith.constant 0 : i32
    return %c0_i32, %c0_i32_0 : i32, i32
  }
  func.func @transform_2(%arg0: i32) -> (i32, i32) {
    %c0_i32 = arith.constant 0 : i32
    %c0_i32_0 = arith.constant 0 : i32
    %c0_i32_1 = arith.constant 0 : i32
    return %c0_i32, %c0_i32_0 : i32, i32
  }
  func.func @transform_3(%arg0: i32) -> (i32, i32) {
    %c0_i32 = arith.constant 0 : i32
    %c0_i32_0 = arith.constant 0 : i32
    %c0_i32_1 = arith.constant 0 : i32
    return %c0_i32, %c0_i32_0 : i32, i32
  }
  func.func @transform_4(%arg0: i32) -> (i32, i32) {
    %c0_i32 = arith.constant 0 : i32
    %c0_i32_0 = arith.constant 0 : i32
    %c0_i32_1 = arith.constant 0 : i32
    return %c0_i32, %c0_i32_0 : i32, i32
  }
  func.func @transform_5(%arg0: i32) -> (i32, i32) {
    %c0_i32 = arith.constant 0 : i32
    %c0_i32_0 = arith.constant 0 : i32
    return %arg0, %c0_i32 : i32, i32
  }
}

module attributes {stable_mosaic.version = 11 : i64} {
  func.func @_transform_kernel(%arg0: i32, %arg1: memref<16x128xf32, #tpu.memory_space<vmem>>, %arg2: memref<128x128xf32, #tpu.memory_space<vmem>>, %arg3: memref<1x128xf32, #tpu.memory_space<vmem>>, %arg4: memref<1x128xf32, #tpu.memory_space<vmem>>, %arg5: memref<1x128xf32, #tpu.memory_space<vmem>>, %arg6: memref<16x128xf32, #tpu.memory_space<vmem>>) attributes {dimension_semantics = [#tpu.dimension_semantics<parallel>], iteration_bounds = array<i64: 1>, scalar_prefetch = 0 : i64, scratch_operands = 0 : i64, tpu.core_type = #tpu.core_type<tc>, window_params = [{transform_indices = @transform_0, window_bounds = array<i64: 16, 128>}, {pipeline_mode = #tpu.pipeline_mode<synchronous>, transform_indices = @transform_1, window_bounds = array<i64: 128, 128>}, {pipeline_mode = #tpu.pipeline_mode<synchronous>, transform_indices = @transform_2, window_bounds = array<i64: 1, 128>}, {pipeline_mode = #tpu.pipeline_mode<synchronous>, transform_indices = @transform_3, window_bounds = array<i64: 1, 128>}, {pipeline_mode = #tpu.pipeline_mode<synchronous>, transform_indices = @transform_4, window_bounds = array<i64: 1, 128>}, {transform_indices = @transform_5, window_bounds = array<i64: 16, 128>}]} {
    %c0 = arith.constant 0 : index
    %c0_0 = arith.constant 0 : index
    %0 = vector.load %arg1[%c0, %c0_0] : memref<16x128xf32, #tpu.memory_space<vmem>>, vector<16x128xf32>
    %c0_1 = arith.constant 0 : index
    %c0_2 = arith.constant 0 : index
    %1 = vector.load %arg2[%c0_1, %c0_2] : memref<128x128xf32, #tpu.memory_space<vmem>>, vector<128x128xf32>
    %cst = arith.constant dense<0.000000e+00> : vector<16x128xf32>
    %2 = tpu.matmul %0, %1, %cst {dimension_numbers = #tpu.dot_dimension_numbers<[1], [0], [0], [1], [0, 0, 1, 1], [], []>} : vector<16x128xf32>, vector<128x128xf32>, vector<16x128xf32> -> vector<16x128xf32>
    %c0_3 = arith.constant 0 : index
    %c0_4 = arith.constant 0 : index
    %3 = vector.load %arg3[%c0_3, %c0_4] : memref<1x128xf32, #tpu.memory_space<vmem>>, vector<1x128xf32>
    %4 = vector.broadcast %3 : vector<1x128xf32> to vector<16x128xf32>
    %5 = arith.addf %2, %4 : vector<16x128xf32>
    %cst_5 = arith.constant 5.000000e-01 : f32
    %6 = vector.broadcast %cst_5 : f32 to vector<16x128xf32>
    %7 = arith.mulf %6, %5 : vector<16x128xf32>
    %cst_6 = arith.constant 0.707106769 : f32
    %8 = vector.broadcast %cst_6 : f32 to vector<16x128xf32>
    %9 = arith.mulf %5, %8 : vector<16x128xf32>
    %10 = math.erf %9 : vector<16x128xf32>
    %cst_7 = arith.constant 1.000000e+00 : f32
    %11 = vector.broadcast %cst_7 : f32 to vector<16x128xf32>
    %12 = arith.addf %11, %10 : vector<16x128xf32>
    %13 = arith.mulf %7, %12 : vector<16x128xf32>
    %cst_8 = arith.constant dense<0.000000e+00> : vector<16xf32>
    %14 = vector.multi_reduction <add>, %13, %cst_8 [1] : vector<16x128xf32> to vector<16xf32>
    %15 = vector.shape_cast %14 : vector<16xf32> to vector<16x1xf32>
    %16 = arith.mulf %13, %13 : vector<16x128xf32>
    %cst_9 = arith.constant dense<0.000000e+00> : vector<16xf32>
    %17 = vector.multi_reduction <add>, %16, %cst_9 [1] : vector<16x128xf32> to vector<16xf32>
    %18 = vector.shape_cast %17 : vector<16xf32> to vector<16x1xf32>
    %cst_10 = arith.constant 7.812500e-03 : f32
    %19 = vector.broadcast %cst_10 : f32 to vector<16x1xf32>
    %20 = arith.mulf %15, %19 : vector<16x1xf32>
    %cst_11 = arith.constant 7.812500e-03 : f32
    %21 = vector.broadcast %cst_11 : f32 to vector<16x1xf32>
    %22 = arith.mulf %18, %21 : vector<16x1xf32>
    %23 = arith.mulf %20, %20 : vector<16x1xf32>
    %24 = arith.subf %22, %23 : vector<16x1xf32>
    %cst_12 = arith.constant 0.000000e+00 : f32
    %25 = vector.broadcast %cst_12 : f32 to vector<16x1xf32>
    %26 = arith.maximumf %24, %25 : vector<16x1xf32>
    %cst_13 = arith.constant 9.99999996E-13 : f32
    %27 = vector.broadcast %cst_13 : f32 to vector<16x1xf32>
    %28 = arith.addf %26, %27 : vector<16x1xf32>
    %29 = math.rsqrt %28 : vector<16x1xf32>
    %30 = vector.broadcast %20 : vector<16x1xf32> to vector<16x128xf32>
    %31 = arith.subf %13, %30 : vector<16x128xf32>
    %32 = vector.broadcast %29 : vector<16x1xf32> to vector<16x128xf32>
    %33 = arith.mulf %31, %32 : vector<16x128xf32>
    %c0_14 = arith.constant 0 : index
    %c0_15 = arith.constant 0 : index
    %34 = vector.load %arg4[%c0_14, %c0_15] : memref<1x128xf32, #tpu.memory_space<vmem>>, vector<1x128xf32>
    %35 = vector.broadcast %34 : vector<1x128xf32> to vector<16x128xf32>
    %36 = arith.mulf %33, %35 : vector<16x128xf32>
    %c0_16 = arith.constant 0 : index
    %c0_17 = arith.constant 0 : index
    %37 = vector.load %arg5[%c0_16, %c0_17] : memref<1x128xf32, #tpu.memory_space<vmem>>, vector<1x128xf32>
    %38 = vector.broadcast %37 : vector<1x128xf32> to vector<16x128xf32>
    %39 = arith.addf %36, %38 : vector<16x128xf32>
    %c0_18 = arith.constant 0 : index
    %c0_19 = arith.constant 0 : index
    %40 = vector.load %arg6[%c0_18, %c0_19] : memref<16x128xf32, #tpu.memory_space<vmem>>, vector<16x128xf32>
    tpu.vector_store %arg6[%c0_18, %c0_19], %39 {strides = array<i32>} : memref<16x128xf32, #tpu.memory_space<vmem>>, vector<16x128xf32>,
    return
  }
  func.func @transform_0(%arg0: i32) -> (i32, i32) {
    %c0_i32 = arith.constant 0 : i32
    %c0_i32_0 = arith.constant 0 : i32
    return %arg0, %c0_i32 : i32, i32
  }
  func.func @transform_1(%arg0: i32) -> (i32, i32) {
    %c0_i32 = arith.constant 0 : i32
    %c0_i32_0 = arith.constant 0 : i32
    %c0_i32_1 = arith.constant 0 : i32
    return %c0_i32, %c0_i32_0 : i32, i32
  }
  func.func @transform_2(%arg0: i32) -> (i32, i32) {
    %c0_i32 = arith.constant 0 : i32
    %c0_i32_0 = arith.constant 0 : i32
    %c0_i32_1 = arith.constant 0 : i32
    return %c0_i32, %c0_i32_0 : i32, i32
  }
  func.func @transform_3(%arg0: i32) -> (i32, i32) {
    %c0_i32 = arith.constant 0 : i32
    %c0_i32_0 = arith.constant 0 : i32
    %c0_i32_1 = arith.constant 0 : i32
    return %c0_i32, %c0_i32_0 : i32, i32
  }
  func.func @transform_4(%arg0: i32) -> (i32, i32) {
    %c0_i32 = arith.constant 0 : i32
    %c0_i32_0 = arith.constant 0 : i32
    %c0_i32_1 = arith.constant 0 : i32
    return %c0_i32, %c0_i32_0 : i32, i32
  }
  func.func @transform_5(%arg0: i32) -> (i32, i32) {
    %c0_i32 = arith.constant 0 : i32
    %c0_i32_0 = arith.constant 0 : i32
    return %arg0, %c0_i32 : i32, i32
  }
}

</mosaic_0001>

<bundles_post_ra>
// kernel: tpu_custom_call.1
= control target key start
LH: loop header
LB: loop body
LE: loop exit
PB: predicated region body
PF: predicated region fallthrough
CT: control target
= control target key end

     0   :  { %10 = vsyncpa [#allocation3], 0  ;;  %s458_s0 = inlined_call_operand.hbm [shape: f32[16,128], index: 0, kind: input, shape index: {}]   ;;  %s459_s1 = inlined_call_operand.hbm [shape: f32[128,128], index: 1, kind: input, shape index: {}]   ;;  %s460_s2 = inlined_call_operand.vmem [shape: f32[1,128], index: 2, kind: input, shape index: {}]   ;;  %s461_s3 = inlined_call_operand.vmem [shape: f32[1,128], index: 3, kind: input, shape index: {}]   ;;  %s462_s4 = inlined_call_operand.vmem [shape: f32[1,128], index: 4, kind: input, shape index: {}]   ;;  %s463_s5 = inlined_call_operand.hbm [shape: f32[16,128], index: 5, kind: output, shape index: {}]  }
   0x1   :  { %11 = vsyncpa [#allocation6], 0 }
   0x2   :  { %12 = vsyncpa [#allocation4], 0  ;;  %s17_s20 = sshll.u32 %s458_s0, 4  ;;  %s378_s21 = smov [#allocation2]   ;;  %s18_s20 = int_to_ptr.hbm [resolvable:$true] %s17_s20 }
   0x3   :  { %s19_s22 = sshll.u32 %s378_s21, 4  ;;  %s30_s25 = sshll.u32 %s459_s1, 4  ;;  %s20_s22 = int_to_ptr.vmem [resolvable:$true] %s19_s22  ;;  %s31_s25 = int_to_ptr.hbm [resolvable:$true] %s30_s25 }
   0x4   :  { %s379_s26 = smov 128   ;;  %s380_s27 = smov 8  }
   0x5   :  { %25 = dma.hbm_to_vmem [thread:$0]  %s18_s20, 256, %s20_s22, [#allocation3], %s379_s26, %s379_s26, %s380_s27  }
   0x6   :  { %s381_s28 = smov [#allocation5]  }
   0x7   :  { %s32_s29 = sshll.u32 %s381_s28, 4  ;;  %s33_s29 = int_to_ptr.vmem [resolvable:$true] %s32_s29 }
   0x8   :  { %38 = dma.hbm_to_vmem [thread:$0]  %s31_s25, 2048, %s33_s29, [#allocation6], %s379_s26, %s379_s26, %s380_s27  }
   0x9   :  { %372 = dma.done.wait [#allocation3], 256  }
   0xa   :  { %373 = vsyncadd [#allocation3], 4294967040 }
   0xb   :  { %374 = dma.done.wait [#allocation6], 2048  }
   0xc   :  { %375 = vsyncadd [#allocation6], 4294965248  ;;  %v70_v0 = vld [vmem:[#allocation5 + $0x78] sm:$0xff]  ;;  %v69_v1 = vld [vmem:[#allocation5 + $0x70] sm:$0xff]  ;;  %s252_s11 = sshll.u32 %s463_s5, 4  ;;  %s253_s11 = int_to_ptr.hbm [resolvable:$true] %s252_s11 }
   0xd   :  { %75 = vmatpush.msra.mxu0 %v70_v0  ;;  %268 = vmatpush.msra.mxu1 %v70_v0  ;;  %v68_v2 = vld [vmem:[#allocation5 + $0x68] sm:$0xff]  ;;  %v67_v3 = vld [vmem:[#allocation5 + $0x60] sm:$0xff]  ;;  %v66_v4 = vld [vmem:[#allocation5 + $0x58] sm:$0xff] }
   0xe   :  { %v65_v5 = vld [vmem:[#allocation5 + $0x50] sm:$0xff]  ;;  %v64_v6 = vld [vmem:[#allocation5 + $0x48] sm:$0xff]  ;;  %v63_v7 = vld [vmem:[#allocation5 + $0x40] sm:$0xff] }
   0xf   :  { %76 = vmatpush.msra.mxu0 %v69_v1  ;;  %269 = vmatpush.msra.mxu1 %v69_v1  ;;  %v62_v8 = vld [vmem:[#allocation5 + $0x38] sm:$0xff]  ;;  %v61_v9 = vld [vmem:[#allocation5 + $0x30] sm:$0xff]  ;;  %v60_v10 = vld [vmem:[#allocation5 + $0x28] sm:$0xff] }
  0x10   :  { %v59_v11 = vld [vmem:[#allocation5 + $0x20] sm:$0xff]  ;;  %v58_v12 = vld [vmem:[#allocation5 + $0x18] sm:$0xff]  ;;  %v57_v13 = vld [vmem:[#allocation5 + $0x10] sm:$0xff] }
  0x11   :  { %77 = vmatpush.msra.mxu0 %v68_v2  ;;  %270 = vmatpush.msra.mxu1 %v68_v2  ;;  %v56_v14 = vld [vmem:[#allocation5 + $0x8] sm:$0xff]  ;;  %v55_v15 = vld [vmem:[#allocation5] sm:$0xff]  ;;  %v53_v16 = vld [vmem:[#allocation2] sm:$0xff] }
  0x12   :  { %v54_v17 = vld [vmem:[#allocation2 + $0x8] sm:$0xff]  ;;  %v289_v18 = vld [vmem:[%s460_s2] ss:$0 sm:$0xff] }
  0x13   :  { %78 = vmatpush.msra.mxu0 %v67_v3  ;;  %271 = vmatpush.msra.mxu1 %v67_v3 }
  0x15   :  { %79 = vmatpush.msra.mxu0 %v66_v4  ;;  %272 = vmatpush.msra.mxu1 %v66_v4 }
  0x17   :  { %80 = vmatpush.msra.mxu0 %v65_v5  ;;  %273 = vmatpush.msra.mxu1 %v65_v5 }
  0x19   :  { %81 = vmatpush.msra.mxu0 %v64_v6  ;;  %274 = vmatpush.msra.mxu1 %v64_v6 }
  0x1b   :  { %82 = vmatpush.msra.mxu0 %v63_v7  ;;  %275 = vmatpush.msra.mxu1 %v63_v7 }
  0x1d   :  { %83 = vmatpush.msra.mxu0 %v62_v8  ;;  %276 = vmatpush.msra.mxu1 %v62_v8 }
  0x1f   :  { %84 = vmatpush.msra.mxu0 %v61_v9  ;;  %277 = vmatpush.msra.mxu1 %v61_v9 }
  0x21   :  { %85 = vmatpush.msra.mxu0 %v60_v10  ;;  %278 = vmatpush.msra.mxu1 %v60_v10 }
  0x23   :  { %86 = vmatpush.msra.mxu0 %v59_v11  ;;  %279 = vmatpush.msra.mxu1 %v59_v11 }
  0x25   :  { %87 = vmatpush.msra.mxu0 %v58_v12  ;;  %280 = vmatpush.msra.mxu1 %v58_v12 }
  0x27   :  { %88 = vmatpush.msra.mxu0 %v57_v13  ;;  %281 = vmatpush.msra.mxu1 %v57_v13 }
  0x29   :  { %89 = vmatpush.msra.mxu0 %v56_v14  ;;  %282 = vmatpush.msra.mxu1 %v56_v14 }
  0x2b   :  { %90 = vmatpush.msra.mxu0 %v55_v15  ;;  %283 = vmatpush.msra.mxu1 %v55_v15 }
  0x2c   :  { %91 = vmatmul.f32.vlgmr.msra.gmra.mxu0 %v53_v16  ;;  %94 = vmatmul.f32.vlgmr.msra.gmra.mxu1 %v54_v17 }
  0xa9   :  { %v92_v19 = vpop.f32.mrf.mxu0  ;;  %v95_v20 = vpop.f32.mrf.mxu1 }
  0xaa   :  { %v428_v21 = vadd.f32 %v289_v18, %v92_v19  ;;  %v430_v22 = vadd.f32 %v289_v18, %v95_v20 }
  0xac   :  { %v433_v23 = vmul.f32 0.70710677, %v428_v21  ;;  %v436_v24 = vmul.f32 0.70710677, %v430_v22 }
  0xae   :  { %v102_v25 = vmul.f32 %v433_v23, %v433_v23  ;;  %v142_v26 = vmul.f32 %v436_v24, %v436_v24 }
  0xb0   :  { %v103_v27 = vmin.f32 %v102_v25, 16.0  ;;  %v143_v28 = vmin.f32 %v142_v26, 16.0 }
  0xb2   :  { %v104_v29 = vmul.f32 2.1237322e-06, %v103_v27  ;;  %v115_v30 = vmul.f32 3.8918573e-05, %v103_v27  ;;  %v144_v31 = vmul.f32 2.1237322e-06, %v143_v28 }
  0xb3   :  { %v155_v32 = vmul.f32 3.8918573e-05, %v143_v28 }
  0xb4   :  { %v105_v33 = vadd.f32 0.00028619796, %v104_v29  ;;  %v116_v34 = vadd.f32 0.001143296, %v115_v30  ;;  %v145_v35 = vadd.f32 0.00028619796, %v144_v31 }
  0xb5   :  { %v156_v36 = vadd.f32 0.001143296, %v155_v32 }
  0xb6   :  { %v106_v37 = vmul.f32 %v105_v33, %v103_v27  ;;  %v117_v38 = vmul.f32 %v116_v34, %v103_v27  ;;  %v146_v39 = vmul.f32 %v145_v35, %v143_v28  ;;  %v98_v34 = vmul.f32 0.5, %v428_v21 }
  0xb7   :  { %v157_v40 = vmul.f32 %v156_v36, %v143_v28 }
  0xb8   :  { %v107_v41 = vadd.f32 0.0036580483, %v106_v37  ;;  %v118_v42 = vadd.f32 0.014752088, %v117_v38  ;;  %v147_v45 = vadd.f32 0.0036580483, %v146_v39 }
  0xb9   :  { %v158_v43 = vadd.f32 0.014752088, %v157_v40  ;;  %v99_v39 = vmul.f32 0.5, %v430_v22 }
  0xba   :  { %v119_v44 = vmul.f32 %v118_v42, %v103_v27  ;;  %v108_v47 = vmul.f32 %v107_v41, %v103_v27  ;;  %v148_v51 = vmul.f32 %v147_v45, %v143_v28 }
  0xbb   :  { %v159_v46 = vmul.f32 %v158_v43, %v143_v28 }
  0xbc   :  { %v120_v48 = vadd.f32 0.112945676, %v119_v44  ;;  %v109_v53 = vadd.f32 0.05243302, %v108_v47  ;;  %v149_v57 = vadd.f32 0.05243302, %v148_v51 }
  0xbd   :  { %v160_v49 = vadd.f32 0.112945676, %v159_v46 }
  0xbe   :  { %v121_v50 = vmul.f32 %v120_v48, %v103_v27  ;;  %v110_v59 = vmul.f32 %v109_v53, %v103_v27  ;;  %v150_v62 = vmul.f32 %v149_v57, %v143_v28 }
  0xbf   :  { %v161_v52 = vmul.f32 %v160_v49, %v143_v28 }
  0xc0   :  { %v122_v54 = vadd.f32 0.4994258, %v121_v50  ;;  %v111_v63 = vadd.f32 0.18741608, %v110_v59  ;;  %v151_v0 = vadd.f32 0.18741608, %v150_v62 }
  0xc1   :  { %v162_v55 = vadd.f32 0.4994258, %v161_v52 }
  0xc2   :  { %v123_v56 = vmul.f32 %v122_v54, %v103_v27  ;;  %v112_v2 = vmul.f32 %v111_v63, %v103_v27  ;;  %v152_v5 = vmul.f32 %v151_v0, %v143_v28  ;;  %v290_v0 = vld [vmem:[%s461_s3] ss:$0 sm:$0xff]  ;;  %s382_s3 = smov [#allocation7]  }
  0xc3   :  { %v163_v58 = vmul.f32 %v162_v55, %v143_v28  ;;  %s250_s8 = sshll.u32 %s382_s3, 4  ;;  %s251_s8 = int_to_ptr.vmem [resolvable:$true] %s250_s8 }
  0xc4   :  { %v124_v60 = vadd.f32 1.0, %v123_v56  ;;  %v113_v8 = vadd.f32 1.1283791, %v112_v2  ;;  %v153_v14 = vadd.f32 1.1283791, %v152_v5 }
  0xc5   :  { %v164_v61 = vadd.f32 1.0, %v163_v58 }
  0xc6   :  { %292 = vrcp.f32 %v124_v60  ;;  %v136_v9 = vand.u32 2147483648, %v124_v60  ;;  %v134_v12 = vand.u32 2147483647, %v124_v60  ;;  %vm130_vm2 = vweird.f32 %v124_v60 }
  0xc7   :  { %294 = vrcp.f32 %v164_v61  ;;  %v176_v13 = vand.u32 2147483648, %v164_v61  ;;  %v174_v16 = vand.u32 2147483647, %v164_v61  ;;  %vm170_vm4 = vweird.f32 %v164_v61 }
  0xc8   :  { %v137_v18 = vor.u32 1.1754944e-38, %v136_v9  ;;  %v114_v20 = vmul.f32 %v113_v8, %v433_v23  ;;  %vm135_vm5 = vcmp.eq.f32.partialorder %v134_v12, 8.507059e+37  ;;  %v154_v28 = vmul.f32 %v153_v14, %v436_v24 }
  0xc9   :  { %v177_v26 = vor.u32 1.1754944e-38, %v176_v13  ;;  %vm175_vm7 = vcmp.eq.f32.partialorder %v174_v16, 8.507059e+37 }
  0xcc   :  { %v293_v1 = vpop.eup %292 }
  0xcd   :  { %v295_v3 = vpop.eup %294  ;;  %v126_v4 = vmul.f32 %v293_v1, %v124_v60  ;;  %vm131_vm0 = vweird.f32 %v293_v1 }
  0xce   :  { %v166_v6 = vmul.f32 %v295_v3, %v164_v61  ;;  %vm171_vm1 = vweird.f32 %v295_v3  ;;  %vm132_vm3 = vmor %vm130_vm2, %vm131_vm0 }
  0xcf   :  { %v127_v7 = vsub.f32 1.0, %v126_v4  ;;  %vm172_vm6 = vmor %vm170_vm4, %vm171_vm1  ;;  %v291_v4 = vld [vmem:[%s462_s4] ss:$0 sm:$0xff] }
  0xd0   :  { %v167_v10 = vsub.f32 1.0, %v166_v6 }
  0xd1   :  { %v128_v11 = vmul.f32 %v293_v1, %v127_v7 }
  0xd2   :  { %v168_v15 = vmul.f32 %v295_v3, %v167_v10 }
  0xd3   :  { %v129_v17 = vadd.f32 %v293_v1, %v128_v11 }
  0xd4   :  { %v169_v19 = vadd.f32 %v295_v3, %v168_v15 }
  0xd5   :  { %v133_v25 = vsel %vm132_vm3, %v293_v1, %v129_v17 }
  0xd6   :  { %v138_v27 = vsel %vm135_vm5, %v137_v18, %v133_v25  ;;  %v173_v29 = vsel %vm172_vm6, %v295_v3, %v169_v19 }
  0xd7   :  { %v139_v30 = vmul.f32 %v138_v27, %v114_v20  ;;  %v178_v31 = vsel %vm175_vm7, %v177_v26, %v173_v29 }
  0xd8   :  { %v179_v32 = vmul.f32 %v178_v31, %v154_v28 }
  0xd9   :  { %v266_v33 = vclamps-f32 %v139_v30, 1.0 }
  0xda   :  { %v267_v36 = vclamps-f32 %v179_v32, 1.0 }
  0xdb   :  { %v182_v35 = vadd.f32 1.0, %v266_v33 }
  0xdc   :  { %v183_v38 = vadd.f32 1.0, %v267_v36 }
  0xdd   :  { %v184_v37 = vmul.f32 %v182_v35, %v98_v34 }
  0xde   :  { %v185_v40 = vmul.f32 %v183_v38, %v99_v39 }
  0xdf   :  { %186 = vadd.xlane.f32.xlu0 %v184_v37  ;;  %v190_v23 = vmul.f32 %v184_v37, %v184_v37 }
  0xe0   :  { %v191_v24 = vmul.f32 %v185_v40, %v185_v40 }
  0xe1   :  { %192 = vadd.xlane.f32.xlu1 %v190_v23 }
  0xe7   :  { %188 = vadd.xlane.f32.xlu0 %v185_v40 }
  0xe9   :  { %194 = vadd.xlane.f32.xlu1 %v191_v24 }
 0x152   :  { %v187_v41 = vpop.xlane.xlu0 %186 }
 0x153   :  { %v196_v42 = vmul.f32 0.0078125, %v187_v41 }
 0x154   :  { %v193_v43 = vpop.xlane.xlu1 %192 }
 0x155   :  { %v200_v44 = vmul.f32 %v196_v42, %v196_v42  ;;  %v198_v45 = vmul.f32 0.0078125, %v193_v43  ;;  %v228_v62 = vsub.f32 %v184_v37, %v196_v42 }
 0x157   :  { %v202_v46 = vsub.f32 %v198_v45, %v200_v44 }
 0x159   :  { %v204_v21 = vmax.f32 %v202_v46, 0.0 }
 0x15a   :  { %v189_v47 = vpop.xlane.xlu0 %188 }
 0x15b   :  { %v206_v48 = vadd.f32 1e-12, %v204_v21  ;;  %v197_v49 = vmul.f32 0.0078125, %v189_v47 }
 0x15c   :  { %v195_v50 = vpop.xlane.xlu1 %194 }
 0x15d   :  { %296 = vrsqrt.f32 %v206_v48  ;;  %v201_v51 = vmul.f32 %v197_v49, %v197_v49  ;;  %v199_v52 = vmul.f32 0.0078125, %v195_v50  ;;  %vm214_vm9 = vweird.f32 %v206_v48 }
 0x15e   :  { %v229_v10 = vsub.f32 %v185_v40, %v197_v49 }
 0x15f   :  { %v203_v22 = vsub.f32 %v199_v52, %v201_v51 }
 0x161   :  { %v205_v53 = vmax.f32 %v203_v22, 0.0 }
 0x163   :  { %v297_v54 = vpop.eup %296  ;;  %v207_v56 = vadd.f32 1e-12, %v205_v53 }
 0x164   :  { %v209_v55 = vmul.f32 %v297_v54, %v206_v48  ;;  %vm215_vm8 = vweird.f32 %v297_v54 }
 0x165   :  { %298 = vrsqrt.f32 %v207_v56  ;;  %vm216_vm10 = vmor %vm214_vm9, %vm215_vm8  ;;  %vm224_vm12 = vweird.f32 %v207_v56 }
 0x166   :  { %v210_v57 = vmul.f32 %v297_v54, %v209_v55 }
 0x168   :  { %v211_v58 = vmul.f32 0.5, %v210_v57 }
 0x16a   :  { %v212_v59 = vsub.f32 1.5, %v211_v58 }
 0x16b   :  { %v299_v60 = vpop.eup %298 }
 0x16c   :  { %v213_v61 = vmul.f32 %v297_v54, %v212_v59  ;;  %v219_v63 = vmul.f32 %v299_v60, %v207_v56  ;;  %vm225_vm11 = vweird.f32 %v299_v60 }
 0x16d   :  { %vm226_vm13 = vmor %vm224_vm12, %vm225_vm11 }
 0x16e   :  { %v217_v1 = vsel %vm216_vm10, %v297_v54, %v213_v61  ;;  %v220_v2 = vmul.f32 %v299_v60, %v219_v63 }
 0x16f   :  { %v230_v3 = vmul.f32 %v228_v62, %v217_v1 }
 0x170   :  { %v221_v5 = vmul.f32 0.5, %v220_v2 }
 0x171   :  { %v236_v6 = vmul.f32 %v290_v0, %v230_v3 }
 0x172   :  { %v222_v7 = vsub.f32 1.5, %v221_v5 }
 0x173   :  { %v242_v8 = vadd.f32 %v291_v4, %v236_v6 }
 0x174   :  { %v223_v9 = vmul.f32 %v299_v60, %v222_v7 }
 0x175   :  { %244 = vst [vmem:[#allocation7] sm:$0xff] %v242_v8 }
 0x176   :  { %v227_v11 = vsel %vm226_vm13, %v299_v60, %v223_v9 }
 0x177   :  { %v231_v12 = vmul.f32 %v229_v10, %v227_v11 }
 0x179   :  { %v237_v13 = vmul.f32 %v290_v0, %v231_v12 }
 0x17b   :  { %v243_v14 = vadd.f32 %v291_v4, %v237_v13 }
 0x17d   :  { %245 = vst [vmem:[#allocation7 + $0x8] sm:$0xff] %v243_v14 }
 0x17e   :  { %258 = dma.vmem_to_hbm [thread:$0]  %s251_s8, 256, %s253_s11, [#allocation4], %s379_s26, %s379_s26, %s380_s27  }
 0x17f   :  { %376 = dma.done.wait [#allocation4], 256  }
 0x180   :  { %377 = vsyncadd [#allocation4], 4294967040 }
 0x181   :  { %263 = vsyncpa [#allocation3], 1 }
 0x182   :  { %264 = vsyncpa [#allocation6], 1 }
 0x183   :  { %265 = vsyncpa [#allocation4], 1 }

// kernel: tpu_custom_call.1
= control target key start
LH: loop header
LB: loop body
LE: loop exit
PB: predicated region body
PF: predicated region fallthrough
CT: control target
= control target key end

     0   :  { %10 = vsyncpa [#allocation3], 0  ;;  %s458_s0 = inlined_call_operand.hbm [shape: f32[16,128], index: 0, kind: input, shape index: {}]   ;;  %s459_s1 = inlined_call_operand.hbm [shape: f32[128,128], index: 1, kind: input, shape index: {}]   ;;  %s460_s2 = inlined_call_operand.vmem [shape: f32[1,128], index: 2, kind: input, shape index: {}]   ;;  %s461_s3 = inlined_call_operand.vmem [shape: f32[1,128], index: 3, kind: input, shape index: {}]   ;;  %s462_s4 = inlined_call_operand.vmem [shape: f32[1,128], index: 4, kind: input, shape index: {}]   ;;  %s463_s5 = inlined_call_operand.hbm [shape: f32[16,128], index: 5, kind: output, shape index: {}]  }
   0x1   :  { %11 = vsyncpa [#allocation6], 0 }
   0x2   :  { %12 = vsyncpa [#allocation4], 0  ;;  %s17_s20 = sshll.u32 %s458_s0, 4  ;;  %s378_s21 = smov [#allocation2]   ;;  %s18_s20 = int_to_ptr.hbm [resolvable:$true] %s17_s20 }
   0x3   :  { %s19_s22 = sshll.u32 %s378_s21, 4  ;;  %s30_s25 = sshll.u32 %s459_s1, 4  ;;  %s20_s22 = int_to_ptr.vmem [resolvable:$true] %s19_s22  ;;  %s31_s25 = int_to_ptr.hbm [resolvable:$true] %s30_s25 }
   0x4   :  { %s379_s26 = smov 128   ;;  %s380_s27 = smov 8  }
   0x5   :  { %25 = dma.hbm_to_vmem [thread:$0]  %s18_s20, 256, %s20_s22, [#allocation3], %s379_s26, %s379_s26, %s380_s27  }
   0x6   :  { %s381_s28 = smov [#allocation5]  }
   0x7   :  { %s32_s29 = sshll.u32 %s381_s28, 4  ;;  %s33_s29 = int_to_ptr.vmem [resolvable:$true] %s32_s29 }
   0x8   :  { %38 = dma.hbm_to_vmem [thread:$0]  %s31_s25, 2048, %s33_s29, [#allocation6], %s379_s26, %s379_s26, %s380_s27  }
   0x9   :  { %372 = dma.done.wait [#allocation3], 256  }
   0xa   :  { %373 = vsyncadd [#allocation3], 4294967040 }
   0xb   :  { %374 = dma.done.wait [#allocation6], 2048  }
   0xc   :  { %375 = vsyncadd [#allocation6], 4294965248  ;;  %v70_v0 = vld [vmem:[#allocation5 + $0x78] sm:$0xff]  ;;  %v69_v1 = vld [vmem:[#allocation5 + $0x70] sm:$0xff]  ;;  %s252_s11 = sshll.u32 %s463_s5, 4  ;;  %s253_s11 = int_to_ptr.hbm [resolvable:$true] %s252_s11 }
   0xd   :  { %75 = vmatpush.msra.mxu0 %v70_v0  ;;  %268 = vmatpush.msra.mxu1 %v70_v0  ;;  %v68_v2 = vld [vmem:[#allocation5 + $0x68] sm:$0xff]  ;;  %v67_v3 = vld [vmem:[#allocation5 + $0x60] sm:$0xff]  ;;  %v66_v4 = vld [vmem:[#allocation5 + $0x58] sm:$0xff] }
   0xe   :  { %v65_v5 = vld [vmem:[#allocation5 + $0x50] sm:$0xff]  ;;  %v64_v6 = vld [vmem:[#allocation5 + $0x48] sm:$0xff]  ;;  %v63_v7 = vld [vmem:[#allocation5 + $0x40] sm:$0xff] }
   0xf   :  { %76 = vmatpush.msra.mxu0 %v69_v1  ;;  %269 = vmatpush.msra.mxu1 %v69_v1  ;;  %v62_v8 = vld [vmem:[#allocation5 + $0x38] sm:$0xff]  ;;  %v61_v9 = vld [vmem:[#allocation5 + $0x30] sm:$0xff]  ;;  %v60_v10 = vld [vmem:[#allocation5 + $0x28] sm:$0xff] }
  0x10   :  { %v59_v11 = vld [vmem:[#allocation5 + $0x20] sm:$0xff]  ;;  %v58_v12 = vld [vmem:[#allocation5 + $0x18] sm:$0xff]  ;;  %v57_v13 = vld [vmem:[#allocation5 + $0x10] sm:$0xff] }
  0x11   :  { %77 = vmatpush.msra.mxu0 %v68_v2  ;;  %270 = vmatpush.msra.mxu1 %v68_v2  ;;  %v56_v14 = vld [vmem:[#allocation5 + $0x8] sm:$0xff]  ;;  %v55_v15 = vld [vmem:[#allocation5] sm:$0xff]  ;;  %v53_v16 = vld [vmem:[#allocation2] sm:$0xff] }
  0x12   :  { %v54_v17 = vld [vmem:[#allocation2 + $0x8] sm:$0xff]  ;;  %v289_v18 = vld [vmem:[%s460_s2] ss:$0 sm:$0xff] }
  0x13   :  { %78 = vmatpush.msra.mxu0 %v67_v3  ;;  %271 = vmatpush.msra.mxu1 %v67_v3 }
  0x15   :  { %79 = vmatpush.msra.mxu0 %v66_v4  ;;  %272 = vmatpush.msra.mxu1 %v66_v4 }
  0x17   :  { %80 = vmatpush.msra.mxu0 %v65_v5  ;;  %273 = vmatpush.msra.mxu1 %v65_v5 }
  0x19   :  { %81 = vmatpush.msra.mxu0 %v64_v6  ;;  %274 = vmatpush.msra.mxu1 %v64_v6 }
  0x1b   :  { %82 = vmatpush.msra.mxu0 %v63_v7  ;;  %275 = vmatpush.msra.mxu1 %v63_v7 }
  0x1d   :  { %83 = vmatpush.msra.mxu0 %v62_v8  ;;  %276 = vmatpush.msra.mxu1 %v62_v8 }
  0x1f   :  { %84 = vmatpush.msra.mxu0 %v61_v9  ;;  %277 = vmatpush.msra.mxu1 %v61_v9 }
  0x21   :  { %85 = vmatpush.msra.mxu0 %v60_v10  ;;  %278 = vmatpush.msra.mxu1 %v60_v10 }
  0x23   :  { %86 = vmatpush.msra.mxu0 %v59_v11  ;;  %279 = vmatpush.msra.mxu1 %v59_v11 }
  0x25   :  { %87 = vmatpush.msra.mxu0 %v58_v12  ;;  %280 = vmatpush.msra.mxu1 %v58_v12 }
  0x27   :  { %88 = vmatpush.msra.mxu0 %v57_v13  ;;  %281 = vmatpush.msra.mxu1 %v57_v13 }
  0x29   :  { %89 = vmatpush.msra.mxu0 %v56_v14  ;;  %282 = vmatpush.msra.mxu1 %v56_v14 }
  0x2b   :  { %90 = vmatpush.msra.mxu0 %v55_v15  ;;  %283 = vmatpush.msra.mxu1 %v55_v15 }
  0x2c   :  { %91 = vmatmul.f32.vlgmr.msra.gmra.mxu0 %v53_v16  ;;  %94 = vmatmul.f32.vlgmr.msra.gmra.mxu1 %v54_v17 }
  0xa9   :  { %v92_v19 = vpop.f32.mrf.mxu0  ;;  %v95_v20 = vpop.f32.mrf.mxu1 }
  0xaa   :  { %v428_v21 = vadd.f32 %v289_v18, %v92_v19  ;;  %v430_v22 = vadd.f32 %v289_v18, %v95_v20 }
  0xac   :  { %v433_v23 = vmul.f32 0.70710677, %v428_v21  ;;  %v436_v24 = vmul.f32 0.70710677, %v430_v22 }
  0xae   :  { %v102_v25 = vmul.f32 %v433_v23, %v433_v23  ;;  %v142_v26 = vmul.f32 %v436_v24, %v436_v24 }
  0xb0   :  { %v103_v27 = vmin.f32 %v102_v25, 16.0  ;;  %v143_v28 = vmin.f32 %v142_v26, 16.0 }
  0xb2   :  { %v104_v29 = vmul.f32 2.1237322e-06, %v103_v27  ;;  %v115_v30 = vmul.f32 3.8918573e-05, %v103_v27  ;;  %v144_v31 = vmul.f32 2.1237322e-06, %v143_v28 }
  0xb3   :  { %v155_v32 = vmul.f32 3.8918573e-05, %v143_v28 }
  0xb4   :  { %v105_v33 = vadd.f32 0.00028619796, %v104_v29  ;;  %v116_v34 = vadd.f32 0.001143296, %v115_v30  ;;  %v145_v35 = vadd.f32 0.00028619796, %v144_v31 }
  0xb5   :  { %v156_v36 = vadd.f32 0.001143296, %v155_v32 }
  0xb6   :  { %v106_v37 = vmul.f32 %v105_v33, %v103_v27  ;;  %v117_v38 = vmul.f32 %v116_v34, %v103_v27  ;;  %v146_v39 = vmul.f32 %v145_v35, %v143_v28  ;;  %v98_v34 = vmul.f32 0.5, %v428_v21 }
  0xb7   :  { %v157_v40 = vmul.f32 %v156_v36, %v143_v28 }
  0xb8   :  { %v107_v41 = vadd.f32 0.0036580483, %v106_v37  ;;  %v118_v42 = vadd.f32 0.014752088, %v117_v38  ;;  %v147_v45 = vadd.f32 0.0036580483, %v146_v39 }
  0xb9   :  { %v158_v43 = vadd.f32 0.014752088, %v157_v40  ;;  %v99_v39 = vmul.f32 0.5, %v430_v22 }
  0xba   :  { %v119_v44 = vmul.f32 %v118_v42, %v103_v27  ;;  %v108_v47 = vmul.f32 %v107_v41, %v103_v27  ;;  %v148_v51 = vmul.f32 %v147_v45, %v143_v28 }
  0xbb   :  { %v159_v46 = vmul.f32 %v158_v43, %v143_v28 }
  0xbc   :  { %v120_v48 = vadd.f32 0.112945676, %v119_v44  ;;  %v109_v53 = vadd.f32 0.05243302, %v108_v47  ;;  %v149_v57 = vadd.f32 0.05243302, %v148_v51 }
  0xbd   :  { %v160_v49 = vadd.f32 0.112945676, %v159_v46 }
  0xbe   :  { %v121_v50 = vmul.f32 %v120_v48, %v103_v27  ;;  %v110_v59 = vmul.f32 %v109_v53, %v103_v27  ;;  %v150_v62 = vmul.f32 %v149_v57, %v143_v28 }
  0xbf   :  { %v161_v52 = vmul.f32 %v160_v49, %v143_v28 }
  0xc0   :  { %v122_v54 = vadd.f32 0.4994258, %v121_v50  ;;  %v111_v63 = vadd.f32 0.18741608, %v110_v59  ;;  %v151_v0 = vadd.f32 0.18741608, %v150_v62 }
  0xc1   :  { %v162_v55 = vadd.f32 0.4994258, %v161_v52 }
  0xc2   :  { %v123_v56 = vmul.f32 %v122_v54, %v103_v27  ;;  %v112_v2 = vmul.f32 %v111_v63, %v103_v27  ;;  %v152_v5 = vmul.f32 %v151_v0, %v143_v28  ;;  %v290_v0 = vld [vmem:[%s461_s3] ss:$0 sm:$0xff]  ;;  %s382_s3 = smov [#allocation7]  }
  0xc3   :  { %v163_v58 = vmul.f32 %v162_v55, %v143_v28  ;;  %s250_s8 = sshll.u32 %s382_s3, 4  ;;  %s251_s8 = int_to_ptr.vmem [resolvable:$true] %s250_s8 }
  0xc4   :  { %v124_v60 = vadd.f32 1.0, %v123_v56  ;;  %v113_v8 = vadd.f32 1.1283791, %v112_v2  ;;  %v153_v14 = vadd.f32 1.1283791, %v152_v5 }
  0xc5   :  { %v164_v61 = vadd.f32 1.0, %v163_v58 }
  0xc6   :  { %292 = vrcp.f32 %v124_v60  ;;  %v136_v9 = vand.u32 2147483648, %v124_v60  ;;  %v134_v12 = vand.u32 2147483647, %v124_v60  ;;  %vm130_vm2 = vweird.f32 %v124_v60 }
  0xc7   :  { %294 = vrcp.f32 %v164_v61  ;;  %v176_v13 = vand.u32 2147483648, %v164_v61  ;;  %v174_v16 = vand.u32 2147483647, %v164_v61  ;;  %vm170_vm4 = vweird.f32 %v164_v61 }
  0xc8   :  { %v137_v18 = vor.u32 1.1754944e-38, %v136_v9  ;;  %v114_v20 = vmul.f32 %v113_v8, %v433_v23  ;;  %vm135_vm5 = vcmp.eq.f32.partialorder %v134_v12, 8.507059e+37  ;;  %v154_v28 = vmul.f32 %v153_v14, %v436_v24 }
  0xc9   :  { %v177_v26 = vor.u32 1.1754944e-38, %v176_v13  ;;  %vm175_vm7 = vcmp.eq.f32.partialorder %v174_v16, 8.507059e+37 }
  0xcc   :  { %v293_v1 = vpop.eup %292 }
  0xcd   :  { %v295_v3 = vpop.eup %294  ;;  %v126_v4 = vmul.f32 %v293_v1, %v124_v60  ;;  %vm131_vm0 = vweird.f32 %v293_v1 }
  0xce   :  { %v166_v6 = vmul.f32 %v295_v3, %v164_v61  ;;  %vm171_vm1 = vweird.f32 %v295_v3  ;;  %vm132_vm3 = vmor %vm130_vm2, %vm131_vm0 }
  0xcf   :  { %v127_v7 = vsub.f32 1.0, %v126_v4  ;;  %vm172_vm6 = vmor %vm170_vm4, %vm171_vm1  ;;  %v291_v4 = vld [vmem:[%s462_s4] ss:$0 sm:$0xff] }
  0xd0   :  { %v167_v10 = vsub.f32 1.0, %v166_v6 }
  0xd1   :  { %v128_v11 = vmul.f32 %v293_v1, %v127_v7 }
  0xd2   :  { %v168_v15 = vmul.f32 %v295_v3, %v167_v10 }
  0xd3   :  { %v129_v17 = vadd.f32 %v293_v1, %v128_v11 }
  0xd4   :  { %v169_v19 = vadd.f32 %v295_v3, %v168_v15 }
  0xd5   :  { %v133_v25 = vsel %vm132_vm3, %v293_v1, %v129_v17 }
  0xd6   :  { %v138_v27 = vsel %vm135_vm5, %v137_v18, %v133_v25  ;;  %v173_v29 = vsel %vm172_vm6, %v295_v3, %v169_v19 }
  0xd7   :  { %v139_v30 = vmul.f32 %v138_v27, %v114_v20  ;;  %v178_v31 = vsel %vm175_vm7, %v177_v26, %v173_v29 }
  0xd8   :  { %v179_v32 = vmul.f32 %v178_v31, %v154_v28 }
  0xd9   :  { %v266_v33 = vclamps-f32 %v139_v30, 1.0 }
  0xda   :  { %v267_v36 = vclamps-f32 %v179_v32, 1.0 }
  0xdb   :  { %v182_v35 = vadd.f32 1.0, %v266_v33 }
  0xdc   :  { %v183_v38 = vadd.f32 1.0, %v267_v36 }
  0xdd   :  { %v184_v37 = vmul.f32 %v182_v35, %v98_v34 }
  0xde   :  { %v185_v40 = vmul.f32 %v183_v38, %v99_v39 }
  0xdf   :  { %186 = vadd.xlane.f32.xlu0 %v184_v37  ;;  %v190_v23 = vmul.f32 %v184_v37, %v184_v37 }
  0xe0   :  { %v191_v24 = vmul.f32 %v185_v40, %v185_v40 }
  0xe1   :  { %192 = vadd.xlane.f32.xlu1 %v190_v23 }
  0xe7   :  { %188 = vadd.xlane.f32.xlu0 %v185_v40 }
  0xe9   :  { %194 = vadd.xlane.f32.xlu1 %v191_v24 }
 0x152   :  { %v187_v41 = vpop.xlane.xlu0 %186 }
 0x153   :  { %v196_v42 = vmul.f32 0.0078125, %v187_v41 }
 0x154   :  { %v193_v43 = vpop.xlane.xlu1 %192 }
 0x155   :  { %v200_v44 = vmul.f32 %v196_v42, %v196_v42  ;;  %v198_v45 = vmul.f32 0.0078125, %v193_v43  ;;  %v228_v62 = vsub.f32 %v184_v37, %v196_v42 }
 0x157   :  { %v202_v46 = vsub.f32 %v198_v45, %v200_v44 }
 0x159   :  { %v204_v21 = vmax.f32 %v202_v46, 0.0 }
 0x15a   :  { %v189_v47 = vpop.xlane.xlu0 %188 }
 0x15b   :  { %v206_v48 = vadd.f32 1e-12, %v204_v21  ;;  %v197_v49 = vmul.f32 0.0078125, %v189_v47 }
 0x15c   :  { %v195_v50 = vpop.xlane.xlu1 %194 }
 0x15d   :  { %296 = vrsqrt.f32 %v206_v48  ;;  %v201_v51 = vmul.f32 %v197_v49, %v197_v49  ;;  %v199_v52 = vmul.f32 0.0078125, %v195_v50  ;;  %vm214_vm9 = vweird.f32 %v206_v48 }
 0x15e   :  { %v229_v10 = vsub.f32 %v185_v40, %v197_v49 }
 0x15f   :  { %v203_v22 = vsub.f32 %v199_v52, %v201_v51 }
 0x161   :  { %v205_v53 = vmax.f32 %v203_v22, 0.0 }
 0x163   :  { %v297_v54 = vpop.eup %296  ;;  %v207_v56 = vadd.f32 1e-12, %v205_v53 }
 0x164   :  { %v209_v55 = vmul.f32 %v297_v54, %v206_v48  ;;  %vm215_vm8 = vweird.f32 %v297_v54 }
 0x165   :  { %298 = vrsqrt.f32 %v207_v56  ;;  %vm216_vm10 = vmor %vm214_vm9, %vm215_vm8  ;;  %vm224_vm12 = vweird.f32 %v207_v56 }
 0x166   :  { %v210_v57 = vmul.f32 %v297_v54, %v209_v55 }
 0x168   :  { %v211_v58 = vmul.f32 0.5, %v210_v57 }
 0x16a   :  { %v212_v59 = vsub.f32 1.5, %v211_v58 }
 0x16b   :  { %v299_v60 = vpop.eup %298 }
 0x16c   :  { %v213_v61 = vmul.f32 %v297_v54, %v212_v59  ;;  %v219_v63 = vmul.f32 %v299_v60, %v207_v56  ;;  %vm225_vm11 = vweird.f32 %v299_v60 }
 0x16d   :  { %vm226_vm13 = vmor %vm224_vm12, %vm225_vm11 }
 0x16e   :  { %v217_v1 = vsel %vm216_vm10, %v297_v54, %v213_v61  ;;  %v220_v2 = vmul.f32 %v299_v60, %v219_v63 }
 0x16f   :  { %v230_v3 = vmul.f32 %v228_v62, %v217_v1 }
 0x170   :  { %v221_v5 = vmul.f32 0.5, %v220_v2 }
 0x171   :  { %v236_v6 = vmul.f32 %v290_v0, %v230_v3 }
 0x172   :  { %v222_v7 = vsub.f32 1.5, %v221_v5 }
 0x173   :  { %v242_v8 = vadd.f32 %v291_v4, %v236_v6 }
 0x174   :  { %v223_v9 = vmul.f32 %v299_v60, %v222_v7 }
 0x175   :  { %244 = vst [vmem:[#allocation7] sm:$0xff] %v242_v8 }
 0x176   :  { %v227_v11 = vsel %vm226_vm13, %v299_v60, %v223_v9 }
 0x177   :  { %v231_v12 = vmul.f32 %v229_v10, %v227_v11 }
 0x179   :  { %v237_v13 = vmul.f32 %v290_v0, %v231_v12 }
 0x17b   :  { %v243_v14 = vadd.f32 %v291_v4, %v237_v13 }
 0x17d   :  { %245 = vst [vmem:[#allocation7 + $0x8] sm:$0xff] %v243_v14 }
 0x17e   :  { %258 = dma.vmem_to_hbm [thread:$0]  %s251_s8, 256, %s253_s11, [#allocation4], %s379_s26, %s379_s26, %s380_s27  }
 0x17f   :  { %376 = dma.done.wait [#allocation4], 256  }
 0x180   :  { %377 = vsyncadd [#allocation4], 4294967040 }
 0x181   :  { %263 = vsyncpa [#allocation3], 1 }
 0x182   :  { %264 = vsyncpa [#allocation6], 1 }
 0x183   :  { %265 = vsyncpa [#allocation4], 1 }

</bundles_post_ra>
